<compile_context>
chip_gen: v6e
topology: v6e:2x2x1
jax: 0.10.0
libtpu: 0.0.40
codegen_flags: <defaults>
</compile_context>

<pallas_src>
import functools

import jax
import jax.numpy as jnp
from jax import lax
from jax.experimental import pallas as pl
from jax.experimental.pallas import tpu as pltpu

LN_EPS = 1e-5          # nn.LayerNorm default
BF16 = jnp.bfloat16


def _layer_norm(x, w, b):
    # x: (N, D) f32; w, b: (1, D) f32
    mu = jnp.mean(x, axis=-1, keepdims=True)
    xc = x - mu
    var = jnp.mean(xc * xc, axis=-1, keepdims=True)
    return xc * lax.rsqrt(var + LN_EPS) * w + b


def _erf_poly(x):
    # Abramowitz & Stegun 7.1.26 rational approximation, |error| <= 1.5e-7.
    # Built from exp / div / FMA only (safe to lower inside Mosaic).
    a1, a2, a3, a4, a5 = 0.254829592, -0.284496736, 1.421413741, -1.453152027, 1.061405429
    p = 0.3275911
    ax = jnp.abs(x)
    t = 1.0 / (1.0 + p * ax)
    poly = ((((a5 * t + a4) * t + a3) * t + a2) * t + a1) * t
    y = 1.0 - poly * jnp.exp(-ax * ax)
    return jnp.where(x >= 0, y, -y)


def _gelu_exact_kernel(x):
    # nn.GELU() default is the exact (erf-based) form.
    return 0.5 * x * (1.0 + _erf_poly(x * (2.0 ** -0.5)))


def _gelu_exact_ref(x):
    return 0.5 * x * (1.0 + lax.erf(x * (2.0 ** -0.5)))


# ----------------------------------------------------------------------------
# Fused per-layer kernel:
#   y   = to_out(MHSA(LN1(x))) + x
#   out = W2(GELU(W1(LN2(y)) + b1)) + b2 + y
# One grid step = one batch element; whole (N, D) sequence resides in VMEM.
# ----------------------------------------------------------------------------
def _layer_kernel(x_ref,
                  ln1w_ref, ln1b_ref, wq_ref, wk_ref, wv_ref, wo_ref, bo_ref,
                  ln2w_ref, ln2b_ref, w1_ref, b1_ref, w2_ref, b2_ref,
                  o_ref, ctx_sc, *, heads, dim_head):
    x = x_ref[...]                                   # (N, D) f32 (batch squeezed)

    # -------------------- attention branch --------------------
    xn = _layer_norm(x, ln1w_ref[...], ln1b_ref[...])            # f32
    xb = jnp.broadcast_to(xn.astype(BF16)[None],
                          (heads,) + xn.shape)                    # (H, N, D) bf16

    # Head-major q/k/v straight from batched MXU matmuls (scale folded in W_q).
    q = jnp.einsum('hnd,hde->hne', xb, wq_ref[...],
                   preferred_element_type=jnp.float32)            # (H, N, Dh)
    k = jnp.einsum('hnd,hde->hne', xb, wk_ref[...],
                   preferred_element_type=jnp.float32)
    v = jnp.einsum('hnd,hde->hne', xb, wv_ref[...],
                   preferred_element_type=jnp.float32)

    dots = jnp.einsum('hqd,hkd->hqk', q.astype(BF16), k.astype(BF16),
                      preferred_element_type=jnp.float32)         # (H, N, N) f32
    m = jnp.max(dots, axis=-1, keepdims=True)
    e = jnp.exp(dots - m)
    p = e * pl.reciprocal(jnp.sum(e, axis=-1, keepdims=True), approx=True)

    ctx = jnp.einsum('hqk,hkd->hqd', p.astype(BF16), v.astype(BF16),
                     preferred_element_type=jnp.float32)          # (H, N, Dh) f32

    # Relayout heads once into a lane-dense (N, inner) bf16 staging buffer so the
    # output projection is a single K=inner matmul (matches torch's
    # rearrange 'b h n d -> b n (h d)' followed by Linear(inner, dim)).
    for h in range(heads):                                        # static slices
        ctx_sc[:, h * dim_head:(h + 1) * dim_head] = ctx[h].astype(BF16)
    attn_out = jnp.dot(ctx_sc[...], wo_ref[...],
                       preferred_element_type=jnp.float32) + bo_ref[...]   # (N, D)
    y = x + attn_out                                              # residual, f32

    # -------------------- feed-forward branch --------------------
    yn = _layer_norm(y, ln2w_ref[...], ln2b_ref[...])
    h1 = jnp.dot(yn.astype(BF16), w1_ref[...],
                 preferred_element_type=jnp.float32) + b1_ref[...]          # (N, H)
    h1 = _gelu_exact_kernel(h1)
    ff_out = jnp.dot(h1.astype(BF16), w2_ref[...],
                     preferred_element_type=jnp.float32) + b2_ref[...]
    o_ref[...] = y + ff_out                                       # residual, f32


def transformer_layer(x, attn_p, ff_p, *, heads, dim_head):
    B, N, D = x.shape
    inner = heads * dim_head
    Hm = ff_p["w1"].shape[1]
    scale = dim_head ** -0.5

    # ---- wrapper-side weight prep (trace-time, outside the kernel) ----
    w_qkv = attn_p["w_qkv"]                                       # (D, 3*inner) f32

    def to_head_major(w2d):                                       # (D, inner) -> (H, D, Dh)
        return jnp.transpose(w2d.reshape(D, heads, dim_head), (1, 0, 2))

    wq = (to_head_major(w_qkv[:, :inner]) * scale).astype(BF16)   # scale folded into Q
    wk = to_head_major(w_qkv[:, inner:2 * inner]).astype(BF16)
    wv = to_head_major(w_qkv[:, 2 * inner:]).astype(BF16)
    wo = attn_p["w_out"].astype(BF16)                             # (inner, D)
    w1 = ff_p["w1"].astype(BF16)                                  # (D, Hm)
    w2 = ff_p["w2"].astype(BF16)                                  # (Hm, D)

    kernel = functools.partial(_layer_kernel, heads=heads, dim_head=dim_head)

    flops = B * (2 * N * D * 3 * inner            # qkv projection
                 + 4 * heads * N * N * dim_head   # q@k^T and attn@v
                 + 2 * N * inner * D              # output projection
                 + 4 * N * D * Hm)                # W1 and W2
    transcendentals = B * (heads * N * N + N * Hm + heads * N)
    bytes_accessed = (2 * B * N * D * 4                                  # x in/out (f32)
                      + 2 * (3 * inner * D + inner * D + D * Hm + Hm * D)  # bf16 weights
                      + 4 * (6 * D + Hm))                                # LN params / biases
    cost = pl.CostEstimate(flops=int(flops), transcendentals=int(transcendentals),
                           bytes_accessed=int(bytes_accessed))

    const_map2 = lambda b: (0, 0)
    const_map3 = lambda b: (0, 0, 0)

    return pl.pallas_call(
        kernel,
        out_shape=jax.ShapeDtypeStruct((B, N, D), x.dtype),
        grid=(B,),
        in_specs=[
            pl.BlockSpec((None, N, D), lambda b: (b, 0, 0)),           # x (batch squeezed)
            pl.BlockSpec((1, D), const_map2),                          # ln1 weight
            pl.BlockSpec((1, D), const_map2),                          # ln1 bias
            pl.BlockSpec((heads, D, dim_head), const_map3),            # W_q (bf16, pre-scaled)
            pl.BlockSpec((heads, D, dim_head), const_map3),            # W_k (bf16)
            pl.BlockSpec((heads, D, dim_head), const_map3),            # W_v (bf16)
            pl.BlockSpec((inner, D), const_map2),                      # W_out (bf16)
            pl.BlockSpec((1, D), const_map2),                          # b_out
            pl.BlockSpec((1, D), const_map2),                          # ln2 weight
            pl.BlockSpec((1, D), const_map2),                          # ln2 bias
            pl.BlockSpec((D, Hm), const_map2),                         # W1 (bf16)
            pl.BlockSpec((1, Hm), const_map2),                         # b1
            pl.BlockSpec((Hm, D), const_map2),                         # W2 (bf16)
            pl.BlockSpec((1, D), const_map2),                          # b2
        ],
        out_specs=pl.BlockSpec((None, N, D), lambda b: (b, 0, 0)),
        scratch_shapes=[pltpu.VMEM((N, inner), BF16)],                 # merged-head ctx
        compiler_params=pltpu.CompilerParams(
            dimension_semantics=("parallel",),
            # 48 MiB: ample for these shapes, leaves headroom inside v7x's
            # 64 MiB/TC physical VMEM (previous 64 MiB left none); trivially
            # fine on v5e/v6e's 128 MiB.
            vmem_limit_bytes=48 * 1024 * 1024),
        cost_estimate=cost,
    )(x, attn_p["ln_w"], attn_p["ln_b"], wq, wk, wv, wo, attn_p["b_out"],
      ff_p["ln_w"], ff_p["ln_b"], w1, ff_p["b1"], w2, ff_p["b2"])


# ----------------------------------------------------------------------------
# Parameter init + full Transformer forward
# ----------------------------------------------------------------------------
def init_transformer_params(key, *, dim, depth, heads, dim_head, mlp_dim):
    inner = heads * dim_head
    layers = []
    for _ in range(depth):
        keys = jax.random.split(key, 5)
        key = keys[0]
        attn_p = {
            "ln_w": jnp.ones((1, dim), jnp.float32),
            "ln_b": jnp.zeros((1, dim), jnp.float32),
            "w_qkv": 0.02 * jax.random.normal(keys[1], (dim, 3 * inner), jnp.float32),
            "w_out": 0.02 * jax.random.normal(keys[2], (inner, dim), jnp.float32),
            "b_out": jnp.zeros((1, dim), jnp.float32),
        }
        ff_p = {
            "ln_w": jnp.ones((1, dim), jnp.float32),
            "ln_b": jnp.zeros((1, dim), jnp.float32),
            "w1": 0.02 * jax.random.normal(keys[3], (dim, mlp_dim), jnp.float32),
            "b1": jnp.zeros((1, mlp_dim), jnp.float32),
            "w2": 0.02 * jax.random.normal(keys[4], (mlp_dim, dim), jnp.float32),
            "b2": jnp.zeros((1, dim), jnp.float32),
        }
        layers.append((attn_p, ff_p))
    return layers


def transformer_forward(x, layers, *, heads, dim_head):
    for attn_p, ff_p in layers:
        x = transformer_layer(x, attn_p, ff_p, heads=heads, dim_head=dim_head)
    return x


# Pure-JAX f32 reference (same math as the PyTorch module) for a sanity check.
def _reference_forward(x, layers, *, heads, dim_head):
    scale = dim_head ** -0.5
    inner = heads * dim_head
    for attn_p, ff_p in layers:
        xn = _layer_norm(x, attn_p["ln_w"], attn_p["ln_b"])
        qkv = jnp.einsum("bnd,de->bne", xn, attn_p["w_qkv"])
        q, k, v = jnp.split(qkv, 3, axis=-1)
        B, N, _ = x.shape
        q = q.reshape(B, N, heads, dim_head)
        k = k.reshape(B, N, heads, dim_head)
        v = v.reshape(B, N, heads, dim_head)
        dots = jnp.einsum("bnhd,bmhd->bhnm", q, k) * scale
        attn = jax.nn.softmax(dots, axis=-1)
        out = jnp.einsum("bhnm,bmhd->bnhd", attn, v).reshape(B, N, inner)
        out = jnp.einsum("bne,ed->bnd", out, attn_p["w_out"]) + attn_p["b_out"]
        x = out + x
        xn = _layer_norm(x, ff_p["ln_w"], ff_p["ln_b"])
        h = _gelu_exact_ref(jnp.einsum("bnd,dh->bnh", xn, ff_p["w1"]) + ff_p["b1"])
        out = jnp.einsum("bnh,hd->bnd", h, ff_p["w2"]) + ff_p["b2"]
        x = out + x
    return x


if __name__ == "__main__":
    # Small, module-consistent shapes: (batch, tokens, dim) sequences.
    B, N = 2, 8
    dim, depth, heads, dim_head, mlp_dim = 32, 2, 4, 16, 64

    key = jax.random.PRNGKey(0)
    kx, kp = jax.random.split(key)
    x = jax.random.normal(kx, (B, N, dim), jnp.float32)
    layers = init_transformer_params(kp, dim=dim, depth=depth, heads=heads,
                                     dim_head=dim_head, mlp_dim=mlp_dim)

    out = transformer_forward(x, layers, heads=heads, dim_head=dim_head)
    out = jax.block_until_ready(out)

    ref = _reference_forward(x, layers, heads=heads, dim_head=dim_head)
    assert out.shape == (B, N, dim)
    # Kernel uses bf16 matmul inputs (f32 accumulation / LN / softmax / residual),
    # so compare against the f32 reference with a bf16-appropriate tolerance.
    assert jnp.allclose(out, ref, atol=2e-2, rtol=2e-2)

    print("KERNEL_OK")
</pallas_src>

<mosaic_0001>
module attributes {stable_mosaic.version = 11 : i64} {
  func.func @_layer_kernel(%arg0: i32, %arg1: memref<1x8x32xf32, #tpu.memory_space<vmem>>, %arg2: memref<1x32xf32, #tpu.memory_space<vmem>>, %arg3: memref<1x32xf32, #tpu.memory_space<vmem>>, %arg4: memref<4x32x16xbf16, #tpu.memory_space<vmem>>, %arg5: memref<4x32x16xbf16, #tpu.memory_space<vmem>>, %arg6: memref<4x32x16xbf16, #tpu.memory_space<vmem>>, %arg7: memref<64x32xbf16, #tpu.memory_space<vmem>>, %arg8: memref<1x32xf32, #tpu.memory_space<vmem>>, %arg9: memref<1x32xf32, #tpu.memory_space<vmem>>, %arg10: memref<1x32xf32, #tpu.memory_space<vmem>>, %arg11: memref<32x64xbf16, #tpu.memory_space<vmem>>, %arg12: memref<1x64xf32, #tpu.memory_space<vmem>>, %arg13: memref<64x32xbf16, #tpu.memory_space<vmem>>, %arg14: memref<1x32xf32, #tpu.memory_space<vmem>>, %arg15: memref<1x8x32xf32, #tpu.memory_space<vmem>>, %arg16: memref<8x64xbf16, #tpu.memory_space<vmem>>) attributes {dimension_semantics = [#tpu.dimension_semantics<parallel>], iteration_bounds = array<i64: 2>, scalar_prefetch = 0 : i64, scratch_operands = 1 : i64, tpu.core_type = #tpu.core_type<tc>, window_params = [{transform_indices = @transform_0, window_bounds = array<i64: 1, 8, 32>}, {pipeline_mode = #tpu.pipeline_mode<synchronous>, transform_indices = @transform_1, window_bounds = array<i64: 1, 32>}, {pipeline_mode = #tpu.pipeline_mode<synchronous>, transform_indices = @transform_2, window_bounds = array<i64: 1, 32>}, {pipeline_mode = #tpu.pipeline_mode<synchronous>, transform_indices = @transform_3, window_bounds = array<i64: 4, 32, 16>}, {pipeline_mode = #tpu.pipeline_mode<synchronous>, transform_indices = @transform_4, window_bounds = array<i64: 4, 32, 16>}, {pipeline_mode = #tpu.pipeline_mode<synchronous>, transform_indices = @transform_5, window_bounds = array<i64: 4, 32, 16>}, {pipeline_mode = #tpu.pipeline_mode<synchronous>, transform_indices = @transform_6, window_bounds = array<i64: 64, 32>}, {pipeline_mode = #tpu.pipeline_mode<synchronous>, transform_indices = @transform_7, window_bounds = array<i64: 1, 32>}, {pipeline_mode = #tpu.pipeline_mode<synchronous>, transform_indices = @transform_8, window_bounds = array<i64: 1, 32>}, {pipeline_mode = #tpu.pipeline_mode<synchronous>, transform_indices = @transform_9, window_bounds = array<i64: 1, 32>}, {pipeline_mode = #tpu.pipeline_mode<synchronous>, transform_indices = @transform_10, window_bounds = array<i64: 32, 64>}, {pipeline_mode = #tpu.pipeline_mode<synchronous>, transform_indices = @transform_11, window_bounds = array<i64: 1, 64>}, {pipeline_mode = #tpu.pipeline_mode<synchronous>, transform_indices = @transform_12, window_bounds = array<i64: 64, 32>}, {pipeline_mode = #tpu.pipeline_mode<synchronous>, transform_indices = @transform_13, window_bounds = array<i64: 1, 32>}, {transform_indices = @transform_14, window_bounds = array<i64: 1, 8, 32>}]} {
    %c0 = arith.constant 0 : index
    %c0_0 = arith.constant 0 : index
    %c0_1 = arith.constant 0 : index
    %0 = vector.load %arg1[%c0, %c0_0, %c0_1] : memref<1x8x32xf32, #tpu.memory_space<vmem>>, vector<1x8x32xf32>
    %1 = vector.shape_cast %0 : vector<1x8x32xf32> to vector<8x32xf32>
    %c0_2 = arith.constant 0 : index
    %c0_3 = arith.constant 0 : index
    %2 = vector.load %arg2[%c0_2, %c0_3] : memref<1x32xf32, #tpu.memory_space<vmem>>, vector<1x32xf32>
    %c0_4 = arith.constant 0 : index
    %c0_5 = arith.constant 0 : index
    %3 = vector.load %arg3[%c0_4, %c0_5] : memref<1x32xf32, #tpu.memory_space<vmem>>, vector<1x32xf32>
    %cst = arith.constant dense<0.000000e+00> : vector<8xf32>
    %4 = vector.multi_reduction <add>, %1, %cst [1] : vector<8x32xf32> to vector<8xf32>
    %5 = vector.shape_cast %4 : vector<8xf32> to vector<8x1xf32>
    %cst_6 = arith.constant 3.200000e+01 : f32
    %6 = vector.broadcast %cst_6 : f32 to vector<8x1xf32>
    %7 = arith.divf %5, %6 : vector<8x1xf32>
    %8 = vector.broadcast %7 : vector<8x1xf32> to vector<8x32xf32>
    %9 = arith.subf %1, %8 : vector<8x32xf32>
    %10 = arith.mulf %9, %9 : vector<8x32xf32>
    %cst_7 = arith.constant dense<0.000000e+00> : vector<8xf32>
    %11 = vector.multi_reduction <add>, %10, %cst_7 [1] : vector<8x32xf32> to vector<8xf32>
    %12 = vector.shape_cast %11 : vector<8xf32> to vector<8x1xf32>
    %cst_8 = arith.constant 3.200000e+01 : f32
    %13 = vector.broadcast %cst_8 : f32 to vector<8x1xf32>
    %14 = arith.divf %12, %13 : vector<8x1xf32>
    %cst_9 = arith.constant 9.99999974E-6 : f32
    %15 = vector.broadcast %cst_9 : f32 to vector<8x1xf32>
    %16 = arith.addf %14, %15 : vector<8x1xf32>
    %17 = math.rsqrt %16 : vector<8x1xf32>
    %18 = vector.broadcast %17 : vector<8x1xf32> to vector<8x32xf32>
    %19 = arith.mulf %9, %18 : vector<8x32xf32>
    %20 = vector.broadcast %2 : vector<1x32xf32> to vector<8x32xf32>
    %21 = arith.mulf %19, %20 : vector<8x32xf32>
    %22 = vector.broadcast %3 : vector<1x32xf32> to vector<8x32xf32>
    %23 = arith.addf %21, %22 : vector<8x32xf32>
    %24 = arith.truncf %23 : vector<8x32xf32> to vector<8x32xbf16>
    %25 = vector.shape_cast %24 : vector<8x32xbf16> to vector<1x8x32xbf16>
    %26 = vector.shape_cast %25 : vector<1x8x32xbf16> to vector<1x8x32xbf16>
    %27 = vector.broadcast %26 : vector<1x8x32xbf16> to vector<4x8x32xbf16>
    %c0_10 = arith.constant 0 : index
    %c0_11 = arith.constant 0 : index
    %c0_12 = arith.constant 0 : index
    %28 = vector.load %arg4[%c0_10, %c0_11, %c0_12] : memref<4x32x16xbf16, #tpu.memory_space<vmem>>, vector<4x32x16xbf16>
    "tpu.trace_start"() <{level = 10 : i32, message = "hnd,hde->hne"}> : () -> ()
    %cst_13 = arith.constant dense<0.000000e+00> : vector<4x8x16xf32>
    %29 = tpu.matmul %27, %28, %cst_13 {dimension_numbers = #tpu.dot_dimension_numbers<[2], [1], [1], [2], [0, 0, 0, 1, 1, 2], [0], [0]>} : vector<4x8x32xbf16>, vector<4x32x16xbf16>, vector<4x8x16xf32> -> vector<4x8x16xf32>
    "tpu.trace_stop"() : () -> ()
    %c0_14 = arith.constant 0 : index
    %c0_15 = arith.constant 0 : index
    %c0_16 = arith.constant 0 : index
    %30 = vector.load %arg5[%c0_14, %c0_15, %c0_16] : memref<4x32x16xbf16, #tpu.memory_space<vmem>>, vector<4x32x16xbf16>
    "tpu.trace_start"() <{level = 10 : i32, message = "hnd,hde->hne"}> : () -> ()
    %cst_17 = arith.constant dense<0.000000e+00> : vector<4x8x16xf32>
    %31 = tpu.matmul %27, %30, %cst_17 {dimension_numbers = #tpu.dot_dimension_numbers<[2], [1], [1], [2], [0, 0, 0, 1, 1, 2], [0], [0]>} : vector<4x8x32xbf16>, vector<4x32x16xbf16>, vector<4x8x16xf32> -> vector<4x8x16xf32>
    "tpu.trace_stop"() : () -> ()
    %c0_18 = arith.constant 0 : index
    %c0_19 = arith.constant 0 : index
    %c0_20 = arith.constant 0 : index
    %32 = vector.load %arg6[%c0_18, %c0_19, %c0_20] : memref<4x32x16xbf16, #tpu.memory_space<vmem>>, vector<4x32x16xbf16>
    "tpu.trace_start"() <{level = 10 : i32, message = "hnd,hde->hne"}> : () -> ()
    %cst_21 = arith.constant dense<0.000000e+00> : vector<4x8x16xf32>
    %33 = tpu.matmul %27, %32, %cst_21 {dimension_numbers = #tpu.dot_dimension_numbers<[2], [1], [1], [2], [0, 0, 0, 1, 1, 2], [0], [0]>} : vector<4x8x32xbf16>, vector<4x32x16xbf16>, vector<4x8x16xf32> -> vector<4x8x16xf32>
    "tpu.trace_stop"() : () -> ()
    %34 = arith.truncf %29 : vector<4x8x16xf32> to vector<4x8x16xbf16>
    %35 = arith.truncf %31 : vector<4x8x16xf32> to vector<4x8x16xbf16>
    "tpu.trace_start"() <{level = 10 : i32, message = "hqd,hkd->hqk"}> : () -> ()
    %cst_22 = arith.constant dense<0.000000e+00> : vector<4x8x8xf32>
    %36 = tpu.matmul %34, %35, %cst_22 {dimension_numbers = #tpu.dot_dimension_numbers<[2], [2], [1], [1], [0, 0, 0, 1, 1, 1], [0], [0]>} : vector<4x8x16xbf16>, vector<4x8x16xbf16>, vector<4x8x8xf32> -> vector<4x8x8xf32>
    "tpu.trace_stop"() : () -> ()
    %cst_23 = arith.constant dense<0xFF800000> : vector<4x8xf32>
    %37 = vector.multi_reduction <maximumf>, %36, %cst_23 [2] : vector<4x8x8xf32> to vector<4x8xf32>
    %38 = vector.shape_cast %37 : vector<4x8xf32> to vector<4x8x1xf32>
    %39 = vector.broadcast %38 : vector<4x8x1xf32> to vector<4x8x8xf32>
    %40 = arith.subf %36, %39 : vector<4x8x8xf32>
    %41 = math.exp %40 : vector<4x8x8xf32>
    %cst_24 = arith.constant dense<0.000000e+00> : vector<4x8xf32>
    %42 = vector.multi_reduction <add>, %41, %cst_24 [2] : vector<4x8x8xf32> to vector<4x8xf32>
    %43 = vector.shape_cast %42 : vector<4x8xf32> to vector<4x8x1xf32>
    %44 = tpu.reciprocal %43 {approx = true} : vector<4x8x1xf32> -> vector<4x8x1xf32>
    %45 = vector.broadcast %44 : vector<4x8x1xf32> to vector<4x8x8xf32>
    %46 = arith.mulf %41, %45 : vector<4x8x8xf32>
    %47 = arith.truncf %46 : vector<4x8x8xf32> to vector<4x8x8xbf16>
    %48 = arith.truncf %33 : vector<4x8x16xf32> to vector<4x8x16xbf16>
    "tpu.trace_start"() <{level = 10 : i32, message = "hqk,hkd->hqd"}> : () -> ()
    %cst_25 = arith.constant dense<0.000000e+00> : vector<4x8x16xf32>
    %49 = tpu.matmul %47, %48, %cst_25 {dimension_numbers = #tpu.dot_dimension_numbers<[2], [1], [1], [2], [0, 0, 0, 1, 1, 2], [0], [0]>} : vector<4x8x8xbf16>, vector<4x8x16xbf16>, vector<4x8x16xf32> -> vector<4x8x16xf32>
    "tpu.trace_stop"() : () -> ()
    %50 = vector.extract_strided_slice %49 {offsets = [0, 0, 0], sizes = [1, 8, 16], strides = [1, 1, 1]} : vector<4x8x16xf32> to vector<1x8x16xf32>
    %51 = vector.shape_cast %50 : vector<1x8x16xf32> to vector<8x16xf32>
    %52 = arith.truncf %51 : vector<8x16xf32> to vector<8x16xbf16>
    %c0_26 = arith.constant 0 : index
    %c0_27 = arith.constant 0 : index
    %53 = vector.load %arg16[%c0_26, %c0_27] : memref<8x64xbf16, #tpu.memory_space<vmem>>, vector<8x16xbf16>
    tpu.vector_store %arg16[%c0_26, %c0_27], %52 {strides = array<i32>} : memref<8x64xbf16, #tpu.memory_space<vmem>>, vector<8x16xbf16>,
    %54 = vector.extract_strided_slice %49 {offsets = [1, 0, 0], sizes = [1, 8, 16], strides = [1, 1, 1]} : vector<4x8x16xf32> to vector<1x8x16xf32>
    %55 = vector.shape_cast %54 : vector<1x8x16xf32> to vector<8x16xf32>
    %56 = arith.truncf %55 : vector<8x16xf32> to vector<8x16xbf16>
    %c0_28 = arith.constant 0 : index
    %c16 = arith.constant 16 : index
    %57 = vector.load %arg16[%c0_28, %c16] : memref<8x64xbf16, #tpu.memory_space<vmem>>, vector<8x16xbf16>
    tpu.vector_store %arg16[%c0_28, %c16], %56 {strides = array<i32>} : memref<8x64xbf16, #tpu.memory_space<vmem>>, vector<8x16xbf16>,
    %58 = vector.extract_strided_slice %49 {offsets = [2, 0, 0], sizes = [1, 8, 16], strides = [1, 1, 1]} : vector<4x8x16xf32> to vector<1x8x16xf32>
    %59 = vector.shape_cast %58 : vector<1x8x16xf32> to vector<8x16xf32>
    %60 = arith.truncf %59 : vector<8x16xf32> to vector<8x16xbf16>
    %c0_29 = arith.constant 0 : index
    %c32 = arith.constant 32 : index
    %61 = vector.load %arg16[%c0_29, %c32] : memref<8x64xbf16, #tpu.memory_space<vmem>>, vector<8x16xbf16>
    tpu.vector_store %arg16[%c0_29, %c32], %60 {strides = array<i32>} : memref<8x64xbf16, #tpu.memory_space<vmem>>, vector<8x16xbf16>,
    %62 = vector.extract_strided_slice %49 {offsets = [3, 0, 0], sizes = [1, 8, 16], strides = [1, 1, 1]} : vector<4x8x16xf32> to vector<1x8x16xf32>
    %63 = vector.shape_cast %62 : vector<1x8x16xf32> to vector<8x16xf32>
    %64 = arith.truncf %63 : vector<8x16xf32> to vector<8x16xbf16>
    %c0_30 = arith.constant 0 : index
    %c48 = arith.constant 48 : index
    %65 = vector.load %arg16[%c0_30, %c48] : memref<8x64xbf16, #tpu.memory_space<vmem>>, vector<8x16xbf16>
    tpu.vector_store %arg16[%c0_30, %c48], %64 {strides = array<i32>} : memref<8x64xbf16, #tpu.memory_space<vmem>>, vector<8x16xbf16>,
    %c0_31 = arith.constant 0 : index
    %c0_32 = arith.constant 0 : index
    %66 = vector.load %arg16[%c0_31, %c0_32] : memref<8x64xbf16, #tpu.memory_space<vmem>>, vector<8x64xbf16>
    %c0_33 = arith.constant 0 : index
    %c0_34 = arith.constant 0 : index
    %67 = vector.load %arg7[%c0_33, %c0_34] : memref<64x32xbf16, #tpu.memory_space<vmem>>, vector<64x32xbf16>
    %cst_35 = arith.constant dense<0.000000e+00> : vector<8x32xf32>
    %68 = tpu.matmul %66, %67, %cst_35 {dimension_numbers = #tpu.dot_dimension_numbers<[1], [0], [0], [1], [0, 0, 1, 1], [], []>} : vector<8x64xbf16>, vector<64x32xbf16>, vector<8x32xf32> -> vector<8x32xf32>
    %c0_36 = arith.constant 0 : index
    %c0_37 = arith.constant 0 : index
    %69 = vector.load %arg8[%c0_36, %c0_37] : memref<1x32xf32, #tpu.memory_space<vmem>>, vector<1x32xf32>
    %70 = vector.broadcast %69 : vector<1x32xf32> to vector<8x32xf32>
    %71 = arith.addf %68, %70 : vector<8x32xf32>
    %72 = arith.addf %1, %71 : vector<8x32xf32>
    %c0_38 = arith.constant 0 : index
    %c0_39 = arith.constant 0 : index
    %73 = vector.load %arg9[%c0_38, %c0_39] : memref<1x32xf32, #tpu.memory_space<vmem>>, vector<1x32xf32>
    %c0_40 = arith.constant 0 : index
    %c0_41 = arith.constant 0 : index
    %74 = vector.load %arg10[%c0_40, %c0_41] : memref<1x32xf32, #tpu.memory_space<vmem>>, vector<1x32xf32>
    %cst_42 = arith.constant dense<0.000000e+00> : vector<8xf32>
    %75 = vector.multi_reduction <add>, %72, %cst_42 [1] : vector<8x32xf32> to vector<8xf32>
    %76 = vector.shape_cast %75 : vector<8xf32> to vector<8x1xf32>
    %cst_43 = arith.constant 3.200000e+01 : f32
    %77 = vector.broadcast %cst_43 : f32 to vector<8x1xf32>
    %78 = arith.divf %76, %77 : vector<8x1xf32>
    %79 = vector.broadcast %78 : vector<8x1xf32> to vector<8x32xf32>
    %80 = arith.subf %72, %79 : vector<8x32xf32>
    %81 = arith.mulf %80, %80 : vector<8x32xf32>
    %cst_44 = arith.constant dense<0.000000e+00> : vector<8xf32>
    %82 = vector.multi_reduction <add>, %81, %cst_44 [1] : vector<8x32xf32> to vector<8xf32>
    %83 = vector.shape_cast %82 : vector<8xf32> to vector<8x1xf32>
    %cst_45 = arith.constant 3.200000e+01 : f32
    %84 = vector.broadcast %cst_45 : f32 to vector<8x1xf32>
    %85 = arith.divf %83, %84 : vector<8x1xf32>
    %cst_46 = arith.constant 9.99999974E-6 : f32
    %86 = vector.broadcast %cst_46 : f32 to vector<8x1xf32>
    %87 = arith.addf %85, %86 : vector<8x1xf32>
    %88 = math.rsqrt %87 : vector<8x1xf32>
    %89 = vector.broadcast %88 : vector<8x1xf32> to vector<8x32xf32>
    %90 = arith.mulf %80, %89 : vector<8x32xf32>
    %91 = vector.broadcast %73 : vector<1x32xf32> to vector<8x32xf32>
    %92 = arith.mulf %90, %91 : vector<8x32xf32>
    %93 = vector.broadcast %74 : vector<1x32xf32> to vector<8x32xf32>
    %94 = arith.addf %92, %93 : vector<8x32xf32>
    %95 = arith.truncf %94 : vector<8x32xf32> to vector<8x32xbf16>
    %c0_47 = arith.constant 0 : index
    %c0_48 = arith.constant 0 : index
    %96 = vector.load %arg11[%c0_47, %c0_48] : memref<32x64xbf16, #tpu.memory_space<vmem>>, vector<32x64xbf16>
    %cst_49 = arith.constant dense<0.000000e+00> : vector<8x64xf32>
    %97 = tpu.matmul %95, %96, %cst_49 {dimension_numbers = #tpu.dot_dimension_numbers<[1], [0], [0], [1], [0, 0, 1, 1], [], []>} : vector<8x32xbf16>, vector<32x64xbf16>, vector<8x64xf32> -> vector<8x64xf32>
    %c0_50 = arith.constant 0 : index
    %c0_51 = arith.constant 0 : index
    %98 = vector.load %arg12[%c0_50, %c0_51] : memref<1x64xf32, #tpu.memory_space<vmem>>, vector<1x64xf32>
    %99 = vector.broadcast %98 : vector<1x64xf32> to vector<8x64xf32>
    %100 = arith.addf %97, %99 : vector<8x64xf32>
    %cst_52 = arith.constant 5.000000e-01 : f32
    %101 = vector.broadcast %cst_52 : f32 to vector<8x64xf32>
    %102 = arith.mulf %101, %100 : vector<8x64xf32>
    %cst_53 = arith.constant 0.707106769 : f32
    %103 = vector.broadcast %cst_53 : f32 to vector<8x64xf32>
    %104 = arith.mulf %100, %103 : vector<8x64xf32>
    %105 = math.absf %104 : vector<8x64xf32>
    %cst_54 = arith.constant 0.327591091 : f32
    %106 = vector.broadcast %cst_54 : f32 to vector<8x64xf32>
    %107 = arith.mulf %106, %105 : vector<8x64xf32>
    %cst_55 = arith.constant 1.000000e+00 : f32
    %108 = vector.broadcast %cst_55 : f32 to vector<8x64xf32>
    %109 = arith.addf %108, %107 : vector<8x64xf32>
    %cst_56 = arith.constant 1.000000e+00 : f32
    %110 = vector.broadcast %cst_56 : f32 to vector<8x64xf32>
    %111 = arith.divf %110, %109 : vector<8x64xf32>
    %cst_57 = arith.constant 1.06140542 : f32
    %112 = vector.broadcast %cst_57 : f32 to vector<8x64xf32>
    %113 = arith.mulf %112, %111 : vector<8x64xf32>
    %cst_58 = arith.constant -1.45315206 : f32
    %114 = vector.broadcast %cst_58 : f32 to vector<8x64xf32>
    %115 = arith.addf %113, %114 : vector<8x64xf32>
    %116 = arith.mulf %115, %111 : vector<8x64xf32>
    %cst_59 = arith.constant 1.42141378 : f32
    %117 = vector.broadcast %cst_59 : f32 to vector<8x64xf32>
    %118 = arith.addf %116, %117 : vector<8x64xf32>
    %119 = arith.mulf %118, %111 : vector<8x64xf32>
    %cst_60 = arith.constant -0.284496725 : f32
    %120 = vector.broadcast %cst_60 : f32 to vector<8x64xf32>
    %121 = arith.addf %119, %120 : vector<8x64xf32>
    %122 = arith.mulf %121, %111 : vector<8x64xf32>
    %cst_61 = arith.constant 0.254829586 : f32
    %123 = vector.broadcast %cst_61 : f32 to vector<8x64xf32>
    %124 = arith.addf %122, %123 : vector<8x64xf32>
    %125 = arith.mulf %124, %111 : vector<8x64xf32>
    %cst_62 = arith.constant 0.000000e+00 : f32
    %126 = vector.broadcast %cst_62 : f32 to vector<8x64xf32>
    %127 = arith.subf %126, %105 : vector<8x64xf32>
    %128 = arith.mulf %127, %105 : vector<8x64xf32>
    %129 = math.exp %128 : vector<8x64xf32>
    %130 = arith.mulf %125, %129 : vector<8x64xf32>
    %cst_63 = arith.constant 1.000000e+00 : f32
    %131 = vector.broadcast %cst_63 : f32 to vector<8x64xf32>
    %132 = arith.subf %131, %130 : vector<8x64xf32>
    %cst_64 = arith.constant 0.000000e+00 : f32
    %133 = vector.broadcast %cst_64 : f32 to vector<8x64xf32>
    %134 = arith.cmpf oge, %104, %133 : vector<8x64xf32>
    %cst_65 = arith.constant 0.000000e+00 : f32
    %135 = vector.broadcast %cst_65 : f32 to vector<8x64xf32>
    %136 = arith.subf %135, %132 : vector<8x64xf32>
    %137 = arith.select %134, %132, %136 : vector<8x64xi1>, vector<8x64xf32>
    %cst_66 = arith.constant 1.000000e+00 : f32
    %138 = vector.broadcast %cst_66 : f32 to vector<8x64xf32>
    %139 = arith.addf %138, %137 : vector<8x64xf32>
    %140 = arith.mulf %102, %139 : vector<8x64xf32>
    %141 = arith.truncf %140 : vector<8x64xf32> to vector<8x64xbf16>
    %c0_67 = arith.constant 0 : index
    %c0_68 = arith.constant 0 : index
    %142 = vector.load %arg13[%c0_67, %c0_68] : memref<64x32xbf16, #tpu.memory_space<vmem>>, vector<64x32xbf16>
    %cst_69 = arith.constant dense<0.000000e+00> : vector<8x32xf32>
    %143 = tpu.matmul %141, %142, %cst_69 {dimension_numbers = #tpu.dot_dimension_numbers<[1], [0], [0], [1], [0, 0, 1, 1], [], []>} : vector<8x64xbf16>, vector<64x32xbf16>, vector<8x32xf32> -> vector<8x32xf32>
    %c0_70 = arith.constant 0 : index
    %c0_71 = arith.constant 0 : index
    %144 = vector.load %arg14[%c0_70, %c0_71] : memref<1x32xf32, #tpu.memory_space<vmem>>, vector<1x32xf32>
    %145 = vector.broadcast %144 : vector<1x32xf32> to vector<8x32xf32>
    %146 = arith.addf %143, %145 : vector<8x32xf32>
    %147 = arith.addf %72, %146 : vector<8x32xf32>
    %c0_72 = arith.constant 0 : index
    %c0_73 = arith.constant 0 : index
    %c0_74 = arith.constant 0 : index
    %148 = vector.load %arg15[%c0_72, %c0_73, %c0_74] : memref<1x8x32xf32, #tpu.memory_space<vmem>>, vector<1x8x32xf32>
    %149 = vector.shape_cast %148 : vector<1x8x32xf32> to vector<8x32xf32>
    %150 = vector.shape_cast %147 : vector<8x32xf32> to vector<1x8x32xf32>
    tpu.vector_store %arg15[%c0_72, %c0_73, %c0_74], %150 {strides = array<i32>} : memref<1x8x32xf32, #tpu.memory_space<vmem>>, vector<1x8x32xf32>,
    return
  }
  func.func @transform_0(%arg0: i32) -> (i32, i32, i32) {
    %c0_i32 = arith.constant 0 : i32
    %c0_i32_0 = arith.constant 0 : i32
    %c0_i32_1 = arith.constant 0 : i32
    return %arg0, %c0_i32, %c0_i32_0 : i32, i32, i32
  }
  func.func @transform_1(%arg0: i32) -> (i32, i32) {
    %c0_i32 = arith.constant 0 : i32
    %c0_i32_0 = arith.constant 0 : i32
    %c0_i32_1 = arith.constant 0 : i32
    return %c0_i32, %c0_i32_0 : i32, i32
  }
  func.func @transform_2(%arg0: i32) -> (i32, i32) {
    %c0_i32 = arith.constant 0 : i32
    %c0_i32_0 = arith.constant 0 : i32
    %c0_i32_1 = arith.constant 0 : i32
    return %c0_i32, %c0_i32_0 : i32, i32
  }
  func.func @transform_3(%arg0: i32) -> (i32, i32, i32) {
    %c0_i32 = arith.constant 0 : i32
    %c0_i32_0 = arith.constant 0 : i32
    %c0_i32_1 = arith.constant 0 : i32
    %c0_i32_2 = arith.constant 0 : i32
    return %c0_i32, %c0_i32_0, %c0_i32_1 : i32, i32, i32
  }
  func.func @transform_4(%arg0: i32) -> (i32, i32, i32) {
    %c0_i32 = arith.constant 0 : i32
    %c0_i32_0 = arith.constant 0 : i32
    %c0_i32_1 = arith.constant 0 : i32
    %c0_i32_2 = arith.constant 0 : i32
    return %c0_i32, %c0_i32_0, %c0_i32_1 : i32, i32, i32
  }
  func.func @transform_5(%arg0: i32) -> (i32, i32, i32) {
    %c0_i32 = arith.constant 0 : i32
    %c0_i32_0 = arith.constant 0 : i32
    %c0_i32_1 = arith.constant 0 : i32
    %c0_i32_2 = arith.constant 0 : i32
    return %c0_i32, %c0_i32_0, %c0_i32_1 : i32, i32, i32
  }
  func.func @transform_6(%arg0: i32) -> (i32, i32) {
    %c0_i32 = arith.constant 0 : i32
    %c0_i32_0 = arith.constant 0 : i32
    %c0_i32_1 = arith.constant 0 : i32
    return %c0_i32, %c0_i32_0 : i32, i32
  }
  func.func @transform_7(%arg0: i32) -> (i32, i32) {
    %c0_i32 = arith.constant 0 : i32
    %c0_i32_0 = arith.constant 0 : i32
    %c0_i32_1 = arith.constant 0 : i32
    return %c0_i32, %c0_i32_0 : i32, i32
  }
  func.func @transform_8(%arg0: i32) -> (i32, i32) {
    %c0_i32 = arith.constant 0 : i32
    %c0_i32_0 = arith.constant 0 : i32
    %c0_i32_1 = arith.constant 0 : i32
    return %c0_i32, %c0_i32_0 : i32, i32
  }
  func.func @transform_9(%arg0: i32) -> (i32, i32) {
    %c0_i32 = arith.constant 0 : i32
    %c0_i32_0 = arith.constant 0 : i32
    %c0_i32_1 = arith.constant 0 : i32
    return %c0_i32, %c0_i32_0 : i32, i32
  }
  func.func @transform_10(%arg0: i32) -> (i32, i32) {
    %c0_i32 = arith.constant 0 : i32
    %c0_i32_0 = arith.constant 0 : i32
    %c0_i32_1 = arith.constant 0 : i32
    return %c0_i32, %c0_i32_0 : i32, i32
  }
  func.func @transform_11(%arg0: i32) -> (i32, i32) {
    %c0_i32 = arith.constant 0 : i32
    %c0_i32_0 = arith.constant 0 : i32
    %c0_i32_1 = arith.constant 0 : i32
    return %c0_i32, %c0_i32_0 : i32, i32
  }
  func.func @transform_12(%arg0: i32) -> (i32, i32) {
    %c0_i32 = arith.constant 0 : i32
    %c0_i32_0 = arith.constant 0 : i32
    %c0_i32_1 = arith.constant 0 : i32
    return %c0_i32, %c0_i32_0 : i32, i32
  }
  func.func @transform_13(%arg0: i32) -> (i32, i32) {
    %c0_i32 = arith.constant 0 : i32
    %c0_i32_0 = arith.constant 0 : i32
    %c0_i32_1 = arith.constant 0 : i32
    return %c0_i32, %c0_i32_0 : i32, i32
  }
  func.func @transform_14(%arg0: i32) -> (i32, i32, i32) {
    %c0_i32 = arith.constant 0 : i32
    %c0_i32_0 = arith.constant 0 : i32
    %c0_i32_1 = arith.constant 0 : i32
    return %arg0, %c0_i32, %c0_i32_0 : i32, i32, i32
  }
}

</mosaic_0001>

<bundles_post_ra>
// kernel: tpu_custom_call.1
= control target key start
LH: loop header
LB: loop body
LE: loop exit
PB: predicated region body
PF: predicated region fallthrough
CT: control target
= control target key end

     0   :  { %s2949_s0 = inlined_call_operand.vmem [shape: f32[2,8,32], index: 0, kind: input, shape index: {}]   ;;  %s2950_s1 = inlined_call_operand.vmem [shape: f32[1,32], index: 1, kind: input, shape index: {}]   ;;  %s2951_s2 = inlined_call_operand.vmem [shape: f32[1,32], index: 2, kind: input, shape index: {}]   ;;  %s2952_s3 = inlined_call_operand.vmem [shape: bf16[4,32,16], index: 3, kind: input, shape index: {}]   ;;  %s2953_s4 = inlined_call_operand.vmem [shape: bf16[4,32,16], index: 4, kind: input, shape index: {}]   ;;  %s2954_s5 = inlined_call_operand.vmem [shape: bf16[4,32,16], index: 5, kind: input, shape index: {}]   ;;  %s2955_s6 = inlined_call_operand.vmem [shape: bf16[64,32], index: 6, kind: input, shape index: {}]   ;;  %s2956_s7 = inlined_call_operand.vmem [shape: f32[1,32], index: 7, kind: input, shape index: {}]   ;;  %s2957_s8 = inlined_call_operand.vmem [shape: f32[1,32], index: 8, kind: input, shape index: {}]   ;;  %s2958_s9 = inlined_call_operand.vmem [shape: f32[1,32], index: 9, kind: input, shape index: {}]   ;;  %s2959_s10 = inlined_call_operand.vmem [shape: bf16[32,64], index: 10, kind: input, shape index: {}]   ;;  %s2960_s11 = inlined_call_operand.vmem [shape: f32[1,64], index: 11, kind: input, shape index: {}]   ;;  %s2961_s12 = inlined_call_operand.vmem [shape: bf16[64,32], index: 12, kind: input, shape index: {}]   ;;  %s2962_s13 = inlined_call_operand.vmem [shape: f32[1,32], index: 13, kind: input, shape index: {}]   ;;  %s2963_s14 = inlined_call_operand.hbm [shape: f32[2,8,32], index: 14, kind: output, shape index: {}]  }
   0x1   :  { %2964 = sst [smem:[#allocation6_spill]] %s2949_s0 }
   0x2   :  { %2965 = sst [smem:[#allocation7_spill]] %s2950_s1 }
   0x3   :  { %2966 = sst [smem:[#allocation8_spill]] %s2951_s2 }
   0x4   :  { %2967 = sst [smem:[#allocation9_spill]] %s2952_s3 }
   0x5   :  { %19 = vsyncpa [#allocation4], 0 }
   0x6   :  { %21 = vsyncpa [#allocation4 + $0x1], 0  ;;  %s2565_s29 = smov 0   ;;  %s2567_s30 = smov 0  }
   0x7   :  { %s2569_s15 = smov 0   ;;  %s2571_s16 = smov 0  }
   0x8 LB: > { %s2586_s17 = sadd.s32 4294967295, %s2482_s16   ;;  %s1999_s18 = sadd.s32 4294967294, %s2482_s16   ;;  %s2482_s16 = sphi %s2571_s16, %s2977_s16   ;;  %s2478_s15 = sphi %s2569_s15, %s2976_s15   ;;  %s2474_s30 = sphi %s2567_s30, %s2975_s30   ;;  %s2470_s29 = sphi %s2565_s29, %s2974_s29  }
   0x9   : > { %s2590_s19 = sadd.s32 1, %s2482_s16   ;;  %s333_s20 = sadd.s32 1, %s2478_s15 }
   0xa   : > { %s330_s21 = ssub.s32 %s2482_s16, %s2590_s19  ;;  %p343_p0 = scmp.ne.s32.totalorder %s2478_s15, %s2474_s30 }
   0xb   : > { %p331_p1 = scmp.eq.s32.totalorder %s330_s21, 0  ;;  %p344_p2 = scmp.eq.s32.totalorder %s2586_s17, 1 }
   0xc   : > { %p349_p3 = scmp.ne.s32.totalorder %s2474_s30, %s2470_s29  ;;  %p350_p4 = scmp.eq.s32.totalorder %s1999_s18, 1 }
   0xd   : > { %s2601_s22 = scalar_select %p331_p1, %s2478_s15, %s333_s20  }
   0xe   : > { %p2603_p5 = por %p344_p2, %p343_p0  ;;  %p2607_p6 = por %p350_p4, %p349_p3 }
   0xf   : > { %p2002_p7 = scmp.ge.s32.totalorder %s2482_s16, 1  ;;  %p414_p8 = scmp.lt.s32.totalorder %s2482_s16, 3 }
  0x11   : > { %p415_p9 = pnand %p2002_p7, %p414_p8 }
  0x12   : > { %p459_p10 = scmp.lt.s32.totalorder (!%p415_p9), %s2586_s17, 1  ;;  %s2970_s0 = sld [smem:[#allocation6_spill]] (!%p415_p9) }
  0x13   : > { %418 = sbr.rel (%p415_p9) target bundleno = 2362 (0x93a), region = 76  ;;  %s2971_s3 = sld [smem:[#allocation9_spill]] (!%p415_p9) }
  0x14   : > { %s2972_s1 = sld [smem:[#allocation7_spill]] (!%p415_p9)  ;;  %s2487_s28 = smov (!%p415_p9), 32  }
  0x15   : > { %s2973_s2 = sld [smem:[#allocation8_spill]] (!%p415_p9)  ;;  %s456_s27 = sand.u32 (!%p415_p9), 1, %s2474_s30  }
  0x16   : > { %s2073_s20 = sshll.u32 (!%p415_p9), %s2586_s17, 7 }
  0x18   : > { %s460_s25 = scalar_select %p459_p10, %s2586_s17, 1  ;;  %vm467_vm0 = vcmask 261120   ;;  %v2484_v9 = vmov 0.0   ;;  %vm2485_vm1 = vmmov 0   ;;  %v2372_v26 = vld [vmem:[%s2953_s4 + $0x8] sm:$0xff]   ;;  %v2373_v27 = vld [vmem:[%s2953_s4 + $0x18] sm:$0xff]  }
  0x19   : > { %v2364_v7 = vld [vmem:[%s2971_s3 + $0x8] sm:$0xff]   ;;  %v2365_v8 = vld [vmem:[%s2971_s3 + $0x18] sm:$0xff]   ;;  %2144 = vmatprep.subr.bf16.mxu0 %v2484_v9  ;;  %2152 = vmatprep.subr.bf16.mxu1 %v2484_v9  ;;  %v2366_v10 = vld [vmem:[%s2971_s3] sm:$0xff]   ;;  %vm1180_vm2 = vcmask 130048   ;;  %vm1421_vm3 = vcmask 1043456   ;;  %vm1365_vm4 = vcmask 64512  }
  0x1a   : > { %s2004_s26 = sshll.u32 %s460_s25, 3  ;;  %2145 = vmatpush3.bf16.msra.mxu0 %v2364_v7  ;;  %2153 = vmatpush3.bf16.msra.mxu1 %v2365_v8  ;;  %v2367_v11 = vld [vmem:[%s2971_s3 + $0x10] sm:$0xff]   ;;  %v2005_v16 = vld [vmem:[%s2972_s1] ss:$0 sm:$0xff]  ;;  %v2368_v21 = vld [vmem:[%s2971_s3 + $0x28] sm:$0xff]   ;;  %vm1604_vm5 = vcmask 125952  }
  0x1b   : > { %s462_s18 = scalar_lea.vmem %s2970_s0, %s2004_s26  ;;  %2146 = vmatprep.subr.bf16.mxu0 %v2484_v9  ;;  %2154 = vmatprep.subr.bf16.mxu1 %v2484_v9  ;;  %v2006_v18 = vld [vmem:[%s2973_s2] ss:$0 sm:$0xff]  ;;  %v2369_v22 = vld [vmem:[%s2971_s3 + $0x38] sm:$0xff]   ;;  %v2371_v25 = vld [vmem:[%s2971_s3 + $0x30] sm:$0xff]   ;;  %s2486_s0 = smov 16   ;;  %vm1613_vm6 = vcmask 257152  }
  0x1c   : > { %v2618_v0 = vld [vmem:[%s462_s18] sm:$0xff]  ;;  %2148 = vmatprep.mubr.msk.bf16.mxu0 %vm2485_vm1, %v2484_v9  ;;  %2156 = vmatprep.mubr.msk.bf16.mxu1 %vm2485_vm1, %v2484_v9  ;;  %v2375_v29 = vld [vmem:[%s2953_s4 + $0x10] sm:$0xff]   ;;  %v2376_v30 = vld [vmem:[%s2953_s4 + $0x28] sm:$0xff]   ;;  %s2488_s18 = smov 48   ;;  %vm1622_vm7 = vcmask 388352   ;;  %vm1631_vm8 = vcmask 519552   ;;  %s2907_s2 = scalar_lea.hbm %s2963_s14, %s2073_s20 }
  0x1d   : > { %v468_v1 = vsel %vm467_vm0, %v2618_v0, 0.0  ;;  %v2370_v24 = vld [vmem:[%s2971_s3 + $0x20] sm:$0xff]   ;;  %v2377_v31 = vld [vmem:[%s2953_s4 + $0x38] sm:$0xff]   ;;  %v2379_v33 = vld [vmem:[%s2953_s4 + $0x30] sm:$0xff]   ;;  %vm1673_vm9 = vcmask 523264   ;;  %s1927_s17 = scalar_lea.sflag [#allocation4], %s456_s27 }
  0x1e   : > { %469 = vadd.xlane.f32.xlu0 %v468_v1  ;;  %2147 = vmatpush3.bf16.msra.mxu0 %v2366_v10  ;;  %v2374_v28 = vld [vmem:[%s2953_s4] sm:$0xff]   ;;  %v2380_v34 = vld [vmem:[%s2954_s5 + $0x8] sm:$0xff]   ;;  %v2381_v35 = vld [vmem:[%s2954_s5 + $0x18] sm:$0xff]  }
  0x1f   : > { %2155 = vmatpush3.bf16.msra.mxu1 %v2367_v11  ;;  %2160 = vmatprep.subr.bf16.mxu0 %v2484_v9  ;;  %v2378_v32 = vld [vmem:[%s2953_s4 + $0x20] sm:$0xff]   ;;  %v2383_v37 = vld [vmem:[%s2954_s5 + $0x10] sm:$0xff]   ;;  %v2384_v38 = vld [vmem:[%s2954_s5 + $0x28] sm:$0xff]  }
  0x20   : > { %2168 = vmatprep.subr.bf16.mxu1 %v2484_v9  ;;  %v2382_v36 = vld [vmem:[%s2954_s5] sm:$0xff]   ;;  %v2385_v39 = vld [vmem:[%s2954_s5 + $0x38] sm:$0xff]   ;;  %v2387_v41 = vld [vmem:[%s2954_s5 + $0x30] sm:$0xff]  }
  0x21   : > { %v2386_v40 = vld [vmem:[%s2954_s5 + $0x20] sm:$0xff]  }
  0xa7   : > { %v470_v2 = vpop.xlane.xlu0 %469 }
  0xa8   : > { %v472_v3 = vmul.f32 0.03125, %v470_v2 }
  0xaa   : > { %v473_v4 = vsub.f32 %v2618_v0, %v472_v3 }
  0xac   : > { %v474_v5 = vmul.f32 %v473_v4, %v473_v4 }
  0xae   : > { %v475_v6 = vsel %vm467_vm0, %v474_v5, 0.0 }
  0xaf   : > { %476 = vadd.xlane.f32.xlu0 %v475_v6 }
 0x138   : > { %v477_v12 = vpop.xlane.xlu0 %476 }
 0x139   : > { %v478_v13 = vmul.f32 0.03125, %v477_v12 }
 0x13b   : > { %v479_v14 = vadd.f32 1e-05, %v478_v13 }
 0x13d   : > { %2398 = vrsqrt.f32 %v479_v14 }
 0x14a   : > { %v2399_v15 = vpop.eup %2398 }
 0x14b   : > { %v481_v17 = vmul.f32 %v2399_v15, %v473_v4 }
 0x14d   : > { %v488_v19 = vmul.f32 %v2005_v16, %v481_v17 }
 0x14f   : > { %v495_v20 = vadd.f32 %v2006_v18, %v488_v19 }
 0x151   : > { %v2658_v23 = vpack.c.bf16 %v495_v20, %v495_v20 }
 0x153   : > { %2149 = vmatmul.mubr.msk.bf16.vlgmr.msra.gmra.mxu0 %vm467_vm0, %v2658_v23  ;;  %2157 = vmatmul.mubr.msk.bf16.vlgmr.msra.gmra.mxu1 %vm467_vm0, %v2658_v23 }
 0x154   : > { %2161 = vmatpush3.bf16.msra.mxu0 %v2368_v21  ;;  %2169 = vmatpush3.bf16.msra.mxu1 %v2369_v22 }
 0x155   : > { %2162 = vmatprep.subr.bf16.mxu0 %v2484_v9  ;;  %2170 = vmatprep.subr.bf16.mxu1 %v2484_v9 }
 0x156   : > { %2164 = vmatprep.mubr.msk.bf16.mxu0 %vm2485_vm1, %v2484_v9  ;;  %2172 = vmatprep.mubr.msk.bf16.mxu1 %vm2485_vm1, %v2484_v9 }
 0x158   : > { %2163 = vmatpush3.bf16.msra.mxu0 %v2370_v24  ;;  %2171 = vmatpush3.bf16.msra.mxu1 %v2371_v25 }
 0x159   : > { %2176 = vmatprep.subr.bf16.mxu0 %v2484_v9  ;;  %2184 = vmatprep.subr.bf16.mxu1 %v2484_v9 }
 0x15b   : > { %2165 = vmatmul.mubr.msk.bf16.vlgmr.msra.gmra.mxu0 %vm467_vm0, %v2658_v23  ;;  %2173 = vmatmul.mubr.msk.bf16.vlgmr.msra.gmra.mxu1 %vm467_vm0, %v2658_v23 }
 0x15c   : > { %2177 = vmatpush3.bf16.msra.mxu0 %v2372_v26  ;;  %2185 = vmatpush3.bf16.msra.mxu1 %v2373_v27 }
 0x15d   : > { %2178 = vmatprep.subr.bf16.mxu0 %v2484_v9  ;;  %2186 = vmatprep.subr.bf16.mxu1 %v2484_v9 }
 0x15e   : > { %2180 = vmatprep.mubr.msk.bf16.mxu0 %vm2485_vm1, %v2484_v9  ;;  %2188 = vmatprep.mubr.msk.bf16.mxu1 %vm2485_vm1, %v2484_v9 }
 0x160   : > { %2179 = vmatpush3.bf16.msra.mxu0 %v2374_v28  ;;  %2187 = vmatpush3.bf16.msra.mxu1 %v2375_v29 }
 0x161   : > { %2192 = vmatprep.subr.bf16.mxu0 %v2484_v9  ;;  %2200 = vmatprep.subr.bf16.mxu1 %v2484_v9 }
 0x163   : > { %2181 = vmatmul.mubr.msk.bf16.vlgmr.msra.gmra.mxu0 %vm467_vm0, %v2658_v23  ;;  %2189 = vmatmul.mubr.msk.bf16.vlgmr.msra.gmra.mxu1 %vm467_vm0, %v2658_v23 }
 0x164   : > { %2193 = vmatpush3.bf16.msra.mxu0 %v2376_v30  ;;  %2201 = vmatpush3.bf16.msra.mxu1 %v2377_v31 }
 0x165   : > { %2194 = vmatprep.subr.bf16.mxu0 %v2484_v9  ;;  %2202 = vmatprep.subr.bf16.mxu1 %v2484_v9 }
 0x166   : > { %2196 = vmatprep.mubr.msk.bf16.mxu0 %vm2485_vm1, %v2484_v9  ;;  %2204 = vmatprep.mubr.msk.bf16.mxu1 %vm2485_vm1, %v2484_v9 }
 0x168   : > { %2195 = vmatpush3.bf16.msra.mxu0 %v2378_v32  ;;  %2203 = vmatpush3.bf16.msra.mxu1 %v2379_v33 }
 0x169   : > { %2208 = vmatprep.subr.bf16.mxu0 %v2484_v9  ;;  %2216 = vmatprep.subr.bf16.mxu1 %v2484_v9 }
 0x16b   : > { %2197 = vmatmul.mubr.msk.bf16.vlgmr.msra.gmra.mxu0 %vm467_vm0, %v2658_v23  ;;  %2205 = vmatmul.mubr.msk.bf16.vlgmr.msra.gmra.mxu1 %vm467_vm0, %v2658_v23 }
 0x16c   : > { %2209 = vmatpush3.bf16.msra.mxu0 %v2380_v34  ;;  %2217 = vmatpush3.bf16.msra.mxu1 %v2381_v35 }
 0x16d   : > { %2210 = vmatprep.subr.bf16.mxu0 %v2484_v9  ;;  %2218 = vmatprep.subr.bf16.mxu1 %v2484_v9 }
 0x16e   : > { %2212 = vmatprep.mubr.msk.bf16.mxu0 %vm2485_vm1, %v2484_v9  ;;  %2220 = vmatprep.mubr.msk.bf16.mxu1 %vm2485_vm1, %v2484_v9 }
 0x170   : > { %2211 = vmatpush3.bf16.msra.mxu0 %v2382_v36  ;;  %2219 = vmatpush3.bf16.msra.mxu1 %v2383_v37 }
 0x171   : > { %2224 = vmatprep.subr.bf16.mxu0 %v2484_v9  ;;  %2232 = vmatprep.subr.bf16.mxu1 %v2484_v9 }
 0x173   : > { %2213 = vmatmul.mubr.msk.bf16.vlgmr.msra.gmra.mxu0 %vm467_vm0, %v2658_v23  ;;  %2221 = vmatmul.mubr.msk.bf16.vlgmr.msra.gmra.mxu1 %vm467_vm0, %v2658_v23 }
 0x174   : > { %2225 = vmatpush3.bf16.msra.mxu0 %v2384_v38  ;;  %2233 = vmatpush3.bf16.msra.mxu1 %v2385_v39 }
 0x175   : > { %2226 = vmatprep.subr.bf16.mxu0 %v2484_v9  ;;  %2234 = vmatprep.subr.bf16.mxu1 %v2484_v9 }
 0x176   : > { %2228 = vmatprep.mubr.msk.bf16.mxu0 %vm2485_vm1, %v2484_v9  ;;  %2236 = vmatprep.mubr.msk.bf16.mxu1 %vm2485_vm1, %v2484_v9 }
 0x178   : > { %2227 = vmatpush3.bf16.msra.mxu0 %v2386_v40  ;;  %2235 = vmatpush3.bf16.msra.mxu1 %v2387_v41 }
 0x179   : > { %2240 = vmatprep.subr.bf16.mxu0 %v2484_v9  ;;  %2246 = vmatprep.subr.bf16.mxu1 %v2484_v9 }
 0x17b   : > { %2229 = vmatmul.mubr.msk.bf16.vlgmr.msra.gmra.mxu0 %vm467_vm0, %v2658_v23  ;;  %2237 = vmatmul.mubr.msk.bf16.vlgmr.msra.gmra.mxu1 %vm467_vm0, %v2658_v23 }
 0x17c   : > { %2242 = vmatprep.mubr.msk.bf16.mxu0 %vm2485_vm1, %v2484_v9  ;;  %2248 = vmatprep.mubr.msk.bf16.mxu1 %vm2485_vm1, %v2484_v9 }
 0x213   : > { %v562_v42 = vpop.f32.mrf.mxu0  ;;  %v614_v43 = vpop.f32.mrf.mxu1 }
 0x214   : > { %v1172_v10 = vpack.c.bf16 %v562_v42, %v562_v42  ;;  %v1173_v11 = vpack.c.bf16 %v614_v43, %v614_v43 }
 0x215   : > { %v2150_v44 = vpop.f32.mrf.mxu0  ;;  %v2158_v45 = vpop.f32.mrf.mxu1 }
 0x217   : > { %v565_v46 = vpop.f32.mrf.mxu0  ;;  %v617_v47 = vpop.f32.mrf.mxu1 }
 0x219   : > { %v2151_v48 = vpop.f32.mrf.mxu0  ;;  %v2159_v49 = vpop.f32.mrf.mxu1 }
 0x21b   : > { %v666_v50 = vpop.f32.mrf.mxu0  ;;  %v718_v51 = vpop.f32.mrf.mxu1 }
 0x21c   : > { %v1174_v24 = vpack.c.bf16 %v666_v50, %v666_v50  ;;  %v1175_v25 = vpack.c.bf16 %v718_v51, %v718_v51 }
 0x21d   : > { %v2166_v52 = vpop.f32.mrf.mxu0  ;;  %v2174_v53 = vpop.f32.mrf.mxu1 }
 0x21f   : > { %v669_v54 = vpop.f32.mrf.mxu0  ;;  %v721_v55 = vpop.f32.mrf.mxu1 }
 0x221   : > { %v2167_v56 = vpop.f32.mrf.mxu0  ;;  %v2175_v57 = vpop.f32.mrf.mxu1 }
 0x223   : > { %v786_v58 = vpop.f32.mrf.mxu0  ;;  %v838_v59 = vpop.f32.mrf.mxu1 }
 0x224   : > { %v1176_v60 = vpack.c.bf16 %v786_v58, %v786_v58  ;;  %v1177_v61 = vpack.c.bf16 %v838_v59, %v838_v59 }
 0x225   : > { %v2182_v62 = vpop.f32.mrf.mxu0  ;;  %v2190_v63 = vpop.f32.mrf.mxu1 }
 0x226   : > { %v1185_v1 = vsel %vm1180_vm2, %v1176_v60, 0  ;;  %v1231_v2 = vsel %vm1180_vm2, %v1177_v61, 0 }
 0x227   : > { %v789_v3 = vpop.f32.mrf.mxu0  ;;  %v841_v4 = vpop.f32.mrf.mxu1  ;;  %2241 = vmatpush3.bf16.xpose.msra.mxu0 %v1185_v1  ;;  %2247 = vmatpush3.bf16.xpose.msra.mxu1 %v1231_v2 }
 0x228   : > { %2252 = vmatprep.subr.bf16.mxu0 %v2484_v9  ;;  %2258 = vmatprep.subr.bf16.mxu1 %v2484_v9 }
 0x229   : > { %v2183_v5 = vpop.f32.mrf.mxu0  ;;  %v2191_v6 = vpop.f32.mrf.mxu1 }
 0x22b   : > { %v890_v7 = vpop.f32.mrf.mxu0  ;;  %v942_v8 = vpop.f32.mrf.mxu1 }
 0x22c   : > { %v1178_v12 = vpack.c.bf16 %v890_v7, %v890_v7  ;;  %v1179_v13 = vpack.c.bf16 %v942_v8, %v942_v8 }
 0x22d   : > { %v2198_v14 = vpop.f32.mrf.mxu0  ;;  %v2206_v15 = vpop.f32.mrf.mxu1 }
 0x22e   : > { %v1277_v16 = vsel %vm1180_vm2, %v1178_v12, 0  ;;  %v1323_v17 = vsel %vm1180_vm2, %v1179_v13, 0  ;;  %2243 = vmatmul.mubr.msk.bf16.vlgmr.msra.gmra.mxu0 %vm1180_vm2, %v1172_v10  ;;  %2249 = vmatmul.mubr.msk.bf16.vlgmr.msra.gmra.mxu1 %vm1180_vm2, %v1173_v11 }
 0x22f   : > { %v893_v18 = vpop.f32.mrf.mxu0  ;;  %v945_v19 = vpop.f32.mrf.mxu1  ;;  %2253 = vmatpush3.bf16.xpose.msra.mxu0 %v1277_v16  ;;  %2259 = vmatpush3.bf16.xpose.msra.mxu1 %v1323_v17 }
 0x230   : > { %2254 = vmatprep.mubr.msk.bf16.mxu0 %vm2485_vm1, %v2484_v9  ;;  %2260 = vmatprep.mubr.msk.bf16.mxu1 %vm2485_vm1, %v2484_v9 }
 0x231   : > { %v2199_v20 = vpop.f32.mrf.mxu0  ;;  %v2207_v21 = vpop.f32.mrf.mxu1  ;;  %2264 = vmatprep.subr.bf16.mxu0 %v2484_v9  ;;  %2270 = vmatprep.subr.bf16.mxu1 %v2484_v9 }
 0x233   : > { %v1010_v22 = vpop.f32.mrf.mxu0  ;;  %v1062_v23 = vpop.f32.mrf.mxu1 }
 0x234   : > { %v1414_v26 = vpack.c.bf16 %v1010_v22, %v1010_v22  ;;  %v1415_v27 = vpack.c.bf16 %v1062_v23, %v1062_v23 }
 0x235   : > { %v2214_v28 = vpop.f32.mrf.mxu0  ;;  %v2222_v29 = vpop.f32.mrf.mxu1 }
 0x236   : > { %v1423_v30 = vsel %vm1421_vm3, %v1414_v26, 0  ;;  %v1469_v31 = vsel %vm1421_vm3, %v1415_v27, 0  ;;  %2255 = vmatmul.mubr.msk.bf16.vlgmr.msra.gmra.mxu0 %vm1180_vm2, %v1174_v24  ;;  %2261 = vmatmul.mubr.msk.bf16.vlgmr.msra.gmra.mxu1 %vm1180_vm2, %v1175_v25 }
 0x237   : > { %v1013_v32 = vpop.f32.mrf.mxu0  ;;  %v1065_v33 = vpop.f32.mrf.mxu1  ;;  %2265 = vmatpush3.bf16.msra.mxu0 %v1423_v30  ;;  %2271 = vmatpush3.bf16.msra.mxu1 %v1469_v31 }
 0x238   : > { %2266 = vmatprep.mubr.msk.bf16.mxu0 %vm2485_vm1, %v2484_v9  ;;  %2276 = vmatprep.subr.bf16.mxu0 %v2484_v9 }
 0x239   : > { %v2215_v34 = vpop.f32.mrf.mxu0  ;;  %v2223_v35 = vpop.f32.mrf.mxu1  ;;  %2272 = vmatprep.mubr.msk.bf16.mxu1 %vm2485_vm1, %v2484_v9  ;;  %2282 = vmatprep.subr.bf16.mxu1 %v2484_v9 }
 0x23b   : > { %v1114_v36 = vpop.f32.mrf.mxu0  ;;  %v1166_v37 = vpop.f32.mrf.mxu1 }
 0x23c   : > { %v1416_v38 = vpack.c.bf16 %v1114_v36, %v1114_v36  ;;  %v1417_v39 = vpack.c.bf16 %v1166_v37, %v1166_v37 }
 0x23d   : > { %v2230_v40 = vpop.f32.mrf.mxu0  ;;  %v2238_v41 = vpop.f32.mrf.mxu1 }
 0x23e   : > { %v2807_v42 = vsel %vm1421_vm3, %v1416_v38, 0  ;;  %v2810_v43 = vsel %vm1421_vm3, %v1417_v39, 0 }
 0x23f   : > { %v1117_v44 = vpop.f32.mrf.mxu0  ;;  %v1169_v45 = vpop.f32.mrf.mxu1 }
 0x241   : > { %v2231_v46 = vpop.f32.mrf.mxu0  ;;  %v2239_v47 = vpop.f32.mrf.mxu1 }
 0x242   : > { %v2390_v47 = vld [vmem:[%s2955_s6 + $0x8] sm:$0xff]  }
 0x2ee   : > { %v1221_v48 = vpop.f32.mrf.mxu0  ;;  %v1267_v49 = vpop.f32.mrf.mxu1 }
 0x2ef   : > { %v1366_v50 = vsel %vm1365_vm4, %v1221_v48, -inf  ;;  %v1369_v55 = vsel %vm1365_vm4, %v1267_v49, -inf }
 0x2f0   : > { %v2250_v51 = vpop.f32.mrf.mxu1  ;;  %1367 = vmax.xlane.f32.xlu1 %v1366_v50  ;;  %v2244_v52 = vpop.f32.mrf.mxu0  ;;  %v2391_v50 = vld [vmem:[%s2955_s6] sm:$0xff]  }
 0x2f2   : > { %v1224_v53 = vpop.f32.mrf.mxu0  ;;  %v1270_v54 = vpop.f32.mrf.mxu1 }
 0x2f4   : > { %v2251_v56 = vpop.f32.mrf.mxu1  ;;  %1370 = vmax.xlane.f32.xlu1 %v1369_v55  ;;  %v2245_v57 = vpop.f32.mrf.mxu0 }
 0x2f6   : > { %v1313_v58 = vpop.f32.mrf.mxu0  ;;  %v1359_v59 = vpop.f32.mrf.mxu1 }
 0x2f7   : > { %v1375_v60 = vsel %vm1365_vm4, %v1359_v59, -inf  ;;  %v1372_v61 = vsel %vm1365_vm4, %v1313_v58, -inf }
 0x2f8   : > { %v2262_v62 = vpop.f32.mrf.mxu1  ;;  %1376 = vmax.xlane.f32.xlu1 %v1375_v60  ;;  %1373 = vmax.xlane.f32.xlu0 %v1372_v61  ;;  %v2256_v63 = vpop.f32.mrf.mxu0 }
 0x2fa   : > { %v1316_v1 = vpop.f32.mrf.mxu0  ;;  %v1362_v2 = vpop.f32.mrf.mxu1 }
 0x2fc   : > { %v2257_v3 = vpop.f32.mrf.mxu0  ;;  %v2263_v4 = vpop.f32.mrf.mxu1 }
 0x379   : > { %v1368_v5 = vpop.xlane.xlu1 %1367 }
 0x37a   : > { %v1378_v6 = vsub.f32 %v1221_v48, %v1368_v5 }
 0x37c   : > { %v1382_v7 = vmul.f32 1.442695, %v1378_v6 }
 0x37d   : > { %v1371_v8 = vpop.xlane.xlu1 %1370 }
 0x37e   : > { %2400 = vpow2.f32 %v1382_v7  ;;  %v1379_v10 = vsub.f32 %v1267_v49, %v1371_v8  ;;  %v2054_v7 = vld [vmem:[%s2956_s7] ss:$0 sm:$0xff] }
 0x380   : > { %v1384_v11 = vmul.f32 1.442695, %v1379_v10 }
 0x381   : > { %v1377_v12 = vpop.xlane.xlu1 %1376  ;;  %v1374_v13 = vpop.xlane.xlu0 %1373 }
 0x382   : > { %2402 = vpow2.f32 %v1384_v11  ;;  %v1381_v14 = vsub.f32 %v1359_v59, %v1377_v12  ;;  %v1380_v15 = vsub.f32 %v1313_v58, %v1374_v13 }
 0x384   : > { %v1388_v16 = vmul.f32 1.442695, %v1381_v14  ;;  %v1386_v17 = vmul.f32 1.442695, %v1380_v15 }
 0x386   : > { %2404 = vpow2.f32 %v1388_v16 }
 0x387   : > { %2406 = vpow2.f32 %v1386_v17 }
 0x38b   : > { %v2401_v18 = vpop.eup %2400 }
 0x38c   : > { %v1390_v19 = vsel %vm1365_vm4, %v2401_v18, 0.0 }
 0x38d   : > { %1391 = vadd.xlane.f32.xlu0 %v1390_v19 }
 0x38f   : > { %v2403_v20 = vpop.eup %2402 }
 0x390   : > { %v1393_v21 = vsel %vm1365_vm4, %v2403_v20, 0.0 }
 0x391   : > { %1394 = vadd.xlane.f32.xlu1 %v1393_v21  ;;  %v2392_v21 = vld [vmem:[%s2959_s10 + $0x8] sm:$0xff]  }
 0x393   : > { %v2405_v22 = vpop.eup %2404 }
 0x394   : > { %v2407_v23 = vpop.eup %2406  ;;  %v1399_v24 = vsel %vm1365_vm4, %v2405_v22, 0.0 }
 0x395   : > { %1400 = vadd.xlane.f32.xlu1 %v1399_v24  ;;  %v1396_v25 = vsel %vm1365_vm4, %v2407_v23, 0.0 }
 0x396   : > { %1397 = vadd.xlane.f32.xlu0 %v1396_v25 }
 0x416   : > { %v1392_v26 = vpop.xlane.xlu0 %1391 }
 0x417   : > { %2408 = vrcp.f32 %v1392_v26  ;;  %v2060_v26 = vld [vmem:[%s2957_s8] ss:$0 sm:$0xff] }
 0x41a   : > { %v1395_v27 = vpop.xlane.xlu1 %1394 }
 0x41b   : > { %2410 = vrcp.f32 %v1395_v27 }
 0x41e   : > { %v1401_v28 = vpop.xlane.xlu1 %1400 }
 0x41f   : > { %2412 = vrcp.f32 %v1401_v28  ;;  %v1398_v29 = vpop.xlane.xlu0 %1397  ;;  %v2061_v28 = vld [vmem:[%s2958_s9] ss:$0 sm:$0xff] }
 0x420   : > { %2414 = vrcp.f32 %v1398_v29 }
 0x424   : > { %v2409_v30 = vpop.eup %2408 }
 0x425   : > { %v1406_v31 = vmul.f32 %v2409_v30, %v2401_v18 }
 0x427   : > { %v1410_v32 = vpack.c.bf16 %v1406_v31, %v1406_v31 }
 0x428   : > { %v2411_v33 = vpop.eup %2410 }
 0x429   : > { %2267 = vmatmul.mubr.msk.bf16.vlgmr.msra.gmra.mxu0 %vm1365_vm4, %v1410_v32  ;;  %v1407_v34 = vmul.f32 %v2411_v33, %v2403_v20  ;;  %v2394_v32 = vld [vmem:[%s2961_s12 + $0x18] sm:$0xff]   ;;  %v2395_v33 = vld [vmem:[%s2961_s12 + $0x10] sm:$0xff]  }
 0x42a   : > { %2277 = vmatpush3.bf16.msra.mxu0 %v2807_v42  ;;  %2278 = vmatprep.mubr.msk.bf16.mxu0 %vm2485_vm1, %v2484_v9  ;;  %v2388_v42 = vld [vmem:[%s2955_s6 + $0x18] sm:$0xff]  }
 0x42b   : > { %v1411_v35 = vpack.c.bf16 %v1407_v34, %v1407_v34  ;;  %2288 = vmatprep.subr.bf16.mxu0 %v2484_v9  ;;  %v2396_v34 = vld [vmem:[%s2961_s12 + $0x8] sm:$0xff]  }
 0x42c   : > { %v2413_v36 = vpop.eup %2412 }
 0x42d   : > { %v2415_v37 = vpop.eup %2414  ;;  %2273 = vmatmul.mubr.msk.bf16.vlgmr.msra.gmra.mxu1 %vm1365_vm4, %v1411_v35  ;;  %v1409_v39 = vmul.f32 %v2413_v36, %v2405_v22  ;;  %v2397_v35 = vld [vmem:[%s2961_s12] sm:$0xff]  }
 0x42e   : > { %2283 = vmatpush3.bf16.msra.mxu1 %v2810_v43  ;;  %v1408_v38 = vmul.f32 %v2415_v37, %v2407_v23  ;;  %2284 = vmatprep.mubr.msk.bf16.mxu1 %vm2485_vm1, %v2484_v9  ;;  %v2389_v43 = vld [vmem:[%s2955_s6 + $0x10] sm:$0xff]   ;;  %v2062_v36 = vld [vmem:[%s2960_s11] ss:$0 sm:$0xff] }
 0x42f   : > { %2300 = vmatprep.subr.bf16.mxu1 %v2484_v9  ;;  %v1413_v41 = vpack.c.bf16 %v1409_v39, %v1409_v39 }
 0x430   : > { %v1412_v40 = vpack.c.bf16 %v1408_v38, %v1408_v38 }
 0x432   : > { %2279 = vmatmul.mubr.msk.bf16.vlgmr.msra.gmra.mxu0 %vm1365_vm4, %v1412_v40 }
 0x433   : > { %2296 = vmatprep.mubr.msk.bf16.mxu0 %vm2485_vm1, %v2484_v9  ;;  %2289 = vmatpush3.bf16.msra.mxu0 %v2388_v42 }
 0x434   : > { %2290 = vmatprep.subr.bf16.mxu0 %v2484_v9 }
 0x435   : > { %2285 = vmatmul.mubr.msk.bf16.vlgmr.msra.gmra.mxu1 %vm1365_vm4, %v1413_v41 }
 0x436   : > { %2304 = vmatprep.mubr.msk.bf16.mxu1 %vm2485_vm1, %v2484_v9  ;;  %2301 = vmatpush3.bf16.msra.mxu1 %v2392_v21 }
 0x437   : > { %2291 = vmatpush3.bf16.msra.mxu0 %v2389_v43  ;;  %2302 = vmatprep.subr.bf16.mxu1 %v2484_v9 }
 0x438   : > { %2292 = vmatprep.subr.bf16.mxu0 %v2484_v9 }
 0x43b   : > { %2293 = vmatpush3.bf16.msra.mxu0 %v2390_v47 }
 0x43c   : > { %2294 = vmatprep.subr.bf16.mxu0 %v2484_v9 }
 0x43f   : > { %2295 = vmatpush3.bf16.msra.mxu0 %v2391_v50 }
 0x4e9   : > { %v1459_v44 = vpop.f32.mrf.mxu0 }
 0x4ea   : > { %v1603_v45 = vpack.c.bf16 %v1459_v44, %v1459_v44 }
 0x4eb   : > { %v2268_v46 = vpop.f32.mrf.mxu0 }
 0x4ec   : > { %1605 = vst.msk [vmem:[#allocation2] sm:$0xf] %vm1604_vm5, %v1603_v45 }
 0x4ed   : > { %v1462_v48 = vpop.f32.mrf.mxu0  ;;  %v1505_v49 = vpop.f32.mrf.mxu1 }
 0x4ee   : > { %v2076_v51 = vpack.c.bf16 %v1505_v49, %v1505_v49 }
 0x4ef   : > { %v2269_v52 = vpop.f32.mrf.mxu0  ;;  %v2274_v53 = vpop.f32.mrf.mxu1 }
 0x4f0   : > { %1610 = vrot.lane.b32.xlu0 %v2076_v51, %s2486_s0  ;;  %s2003_s0 = sshll.u32 %s456_s27, 3 }
 0x4f1   : > { %v1508_v54 = vpop.f32.mrf.mxu1  ;;  %s458_s21 = scalar_lea.vmem [#allocation3], %s2003_s0 }
 0x4f2   : > { %v1551_v55 = vpop.f32.mrf.mxu0  ;;  %s1940_s25 = sshll.u32 %s458_s21, 4  ;;  %s2909_s25 = int_to_ptr.vmem [resolvable:$true] %s1940_s25 }
 0x4f3   : > { %v2077_v56 = vpack.c.bf16 %v1551_v55, %v1551_v55  ;;  %v2275_v57 = vpop.f32.mrf.mxu1  ;;  %s2422_s0 = scalar_lea.vmem %s2909_s25, 128 }
 0x4f4   : > { %v2280_v58 = vpop.f32.mrf.mxu0  ;;  %p2423_p11 = scmp.ne.s32.totalorder %s2909_s25, %s2422_s0 }
 0x4f5   : > { %1619 = vrot.lane.b32.xlu1 %v2077_v56, %s2487_s28  ;;  %v1597_v59 = vpop.f32.mrf.mxu1  ;;  %s2489_s28 = smov [#allocation3]  }
 0x4f6   : > { %v1554_v60 = vpop.f32.mrf.mxu0  ;;  %v2078_v61 = vpack.c.bf16 %v1597_v59, %v1597_v59  ;;  %p2424_p12 = pnand %p2423_p11, %p2603_p5 }
 0x4f7   : > { %v2286_v62 = vpop.f32.mrf.mxu1 }
 0x4f8   : > { %v2281_v63 = vpop.f32.mrf.mxu0  ;;  %p2425_p13 = pneg %p2424_p12 }
 0x4f9   : > { %1628 = vrot.lane.b32.xlu1 %v2078_v61, %s2488_s18  ;;  %v1600_v1 = vpop.f32.mrf.mxu1  ;;  %s2426_s18 = sshll.u32 %s2489_s28, 4  ;;  %s2427_s18 = int_to_ptr.vmem [resolvable:$false] %s2426_s18 }
 0x4fa   : > { %s2428_s1 = scalar_lea.vmem %s2427_s18, 256  ;;  %p2429_p0 = scmp.lt.s32.totalorder %s2909_s25, %s2427_s18 }
 0x4fb   : > { %v2287_v2 = vpop.f32.mrf.mxu1  ;;  %p2430_p1 = scmp.lt.s32.totalorder %s2428_s1, %s2422_s0 }
 0x4fd   : > { %p2431_p2 = por %p2430_p1, %p2429_p0 }
 0x4ff   : > { %p2432_p3 = pnand %p2431_p2, %p2425_p13 }
 0x562   : > { %v1611_v3 = vpop.permute.xlu0 %1610 }
 0x563   : > { %1614 = vst.msk [vmem:[#allocation2] sm:$0xf] %vm1613_vm6, %v1611_v3 }
 0x567   : > { %v1620_v4 = vpop.permute.xlu1 %1619 }
 0x568   : > { %1623 = vst.msk [vmem:[#allocation2] sm:$0xf] %vm1622_vm7, %v1620_v4  ;;  %v2066_v4 = vld [vmem:[%s2962_s13] ss:$0 sm:$0xff] }
 0x56b   : > { %v1629_v5 = vpop.permute.xlu1 %1628 }
 0x56c   : > { %1632 = vst.msk [vmem:[#allocation2] sm:$0xf] %vm1631_vm8, %v1629_v5 }
 0x573   : > { %v1633_v6 = vld [vmem:[#allocation2] sm:$0xf] }
 0x574   : > { %2297 = vmatmul.mubr.msk.bf16.vlgmr.msra.gmra.mxu0 %vm1673_vm9, %v1633_v6 }
 0x634   : > { %v1711_v8 = vpop.f32.mrf.mxu0 }
 0x635   : > { %v1712_v10 = vadd.f32 %v2054_v7, %v1711_v8 }
 0x636   : > { %v2298_v11 = vpop.f32.mrf.mxu0 }
 0x637   : > { %v2856_v12 = vadd.f32 %v1712_v10, %v2618_v0  ;;  %v2393_v0 = vld [vmem:[%s2959_s10] sm:$0xff]  }
 0x638   : > { %v1714_v13 = vpop.f32.mrf.mxu0  ;;  %2303 = vmatpush3.bf16.msra.mxu1 %v2393_v0 }
 0x639   : > { %v1720_v14 = vsel %vm467_vm0, %v2856_v12, 0.0  ;;  %2308 = vmatprep.subr.bf16.mxu1 %v2484_v9 }
 0x63a   : > { %1721 = vadd.xlane.f32.xlu1 %v1720_v14  ;;  %v2299_v15 = vpop.f32.mrf.mxu0 }
 0x6c3   : > { %v1722_v16 = vpop.xlane.xlu1 %1721 }
 0x6c4   : > { %v1723_v17 = vmul.f32 0.03125, %v1722_v16 }
 0x6c6   : > { %v1724_v18 = vsub.f32 %v2856_v12, %v1723_v17 }
 0x6c8   : > { %v1725_v19 = vmul.f32 %v1724_v18, %v1724_v18 }
 0x6ca   : > { %v1726_v20 = vsel %vm467_vm0, %v1725_v19, 0.0 }
 0x6cb   : > { %1727 = vadd.xlane.f32.xlu0 %v1726_v20 }
 0x754   : > { %v1728_v22 = vpop.xlane.xlu0 %1727 }
 0x755   : > { %v1729_v23 = vmul.f32 0.03125, %v1728_v22 }
 0x757   : > { %v1730_v24 = vadd.f32 1e-05, %v1729_v23 }
 0x759   : > { %2416 = vrsqrt.f32 %v1730_v24 }
 0x766   : > { %v2417_v25 = vpop.eup %2416 }
 0x767   : > { %v1732_v27 = vmul.f32 %v2417_v25, %v1724_v18 }
 0x769   : > { %v1739_v29 = vmul.f32 %v2060_v26, %v1732_v27 }
 0x76b   : > { %v1746_v30 = vadd.f32 %v2061_v28, %v1739_v29 }
 0x76d   : > { %v1747_v31 = vpack.c.bf16 %v1746_v30, %v1746_v30 }
 0x76f   : > { %2305 = vmatmul.mubr.msk.bf16.vlgmr.msra.gmra.mxu1 %vm467_vm0, %v1747_v31 }
 0x770   : > { %2316 = vmatprep.mubr.msk.bf16.mxu1 %vm2485_vm1, %v2484_v9  ;;  %2309 = vmatpush3.bf16.msra.mxu1 %v2394_v32 }
 0x771   : > { %2310 = vmatprep.subr.bf16.mxu1 %v2484_v9 }
 0x774   : > { %2311 = vmatpush3.bf16.msra.mxu1 %v2395_v33 }
 0x775   : > { %2312 = vmatprep.subr.bf16.mxu1 %v2484_v9 }
 0x778   : > { %2313 = vmatpush3.bf16.msra.mxu1 %v2396_v34 }
 0x779   : > { %2314 = vmatprep.subr.bf16.mxu1 %v2484_v9 }
 0x77c   : > { %2315 = vmatpush3.bf16.msra.mxu1 %v2397_v35 }
 0x82f   : > { %v1808_v37 = vpop.f32.mrf.mxu1 }
 0x830   : > { %v1809_v38 = vadd.f32 %v2062_v36, %v1808_v37 }
 0x831   : > { %v2306_v39 = vpop.f32.mrf.mxu1 }
 0x832   : > { %v1815_v40 = vmul.f32 0.70710677, %v1809_v38  ;;  %v1814_v63 = vmul.f32 0.5, %v1809_v38 }
 0x833   : > { %v1811_v41 = vpop.f32.mrf.mxu1 }
 0x834   : > { %v1816_v42 = vand.u32 2147483647, %v1815_v40  ;;  %vm1836_vm10 = vcmp.ge.f32.partialorder %v1815_v40, 0.0 }
 0x835   : > { %v2307_v43 = vpop.f32.mrf.mxu1 }
 0x836   : > { %v1817_v44 = vmul.f32 0.3275911, %v1816_v42  ;;  %v1830_v9 = vsub.f32 0.0, %v1816_v42 }
 0x838   : > { %v1818_v45 = vadd.f32 1.0, %v1817_v44  ;;  %v1831_v46 = vmul.f32 %v1830_v9, %v1816_v42 }
 0x83a   : > { %2418 = vrcp.f32 %v1818_v45  ;;  %v1832_v49 = vmul.f32 1.442695, %v1831_v46 }
 0x83c   : > { %2420 = vpow2.f32 %v1832_v49 }
 0x847   : > { %v2419_v47 = vpop.eup %2418 }
 0x848   : > { %v1821_v48 = vmul.f32 1.0614054, %v2419_v47 }
 0x849   : > { %v2421_v58 = vpop.eup %2420 }
 0x84a   : > { %v1822_v50 = vadd.f32 -1.4531521, %v1821_v48 }
 0x84c   : > { %v1823_v51 = vmul.f32 %v2419_v47, %v1822_v50 }
 0x84e   : > { %v1824_v52 = vadd.f32 1.4214138, %v1823_v51 }
 0x850   : > { %v1825_v53 = vmul.f32 %v2419_v47, %v1824_v52 }
 0x852   : > { %v1826_v54 = vadd.f32 -0.28449672, %v1825_v53 }
 0x854   : > { %v1827_v55 = vmul.f32 %v2419_v47, %v1826_v54 }
 0x856   : > { %v1828_v56 = vadd.f32 0.2548296, %v1827_v55 }
 0x858   : > { %v1829_v57 = vmul.f32 %v2419_v47, %v1828_v56 }
 0x85a   : > { %v1834_v59 = vmul.f32 %v2421_v58, %v1829_v57 }
 0x85c   : > { %v1835_v60 = vsub.f32 1.0, %v1834_v59 }
 0x85e   : > { %v1837_v61 = vsub.f32 0.0, %v1835_v60 }
 0x860   : > { %v1838_v62 = vsel %vm1836_vm10, %v1835_v60, %v1837_v61 }
 0x861   : > { %v1839_v1 = vadd.f32 1.0, %v1838_v62 }
 0x863   : > { %v1840_v2 = vmul.f32 %v1839_v1, %v1814_v63 }
 0x865   : > { %v1841_v3 = vpack.c.bf16 %v1840_v2, %v1840_v2 }
 0x867   : > { %2317 = vmatmul.mubr.msk.bf16.vlgmr.msra.gmra.mxu1 %vm1673_vm9, %v1841_v3 }
 0x927   : > { %v1918_v5 = vpop.f32.mrf.mxu1 }
 0x928   : > { %v1919_v6 = vadd.f32 %v2066_v4, %v1918_v5 }
 0x929   : > { %v2318_v7 = vpop.f32.mrf.mxu1 }
 0x92a   : > { %v1924_v8 = vadd.f32 %v1919_v6, %v2856_v12 }
 0x92b   : > { %v1921_v10 = vpop.f32.mrf.mxu1 }
 0x92c   : > { %1925 = vst.msk [vmem:[%s458_s21] sm:$0xff] %vm467_vm0, %v1924_v8 }
 0x92d   : > { %v2319_v11 = vpop.f32.mrf.mxu1 }
 0x92e   : > { %2435 = shalt.err (!%p2432_p3)
}
 0x92f   : > { %s2436_s20 = scalar_lea.hbm %s2907_s2, 128  ;;  %s2440_s26 = scalar_lea.hbm %s2963_s14, 256 }
 0x930   : > { %p2437_p4 = scmp.ne.s32.totalorder %s2907_s2, %s2436_s20  ;;  %p2441_p9 = scmp.lt.s32.totalorder %s2907_s2, %s2963_s14 }
 0x931   : > { %p2442_p10 = scmp.lt.s32.totalorder %s2440_s26, %s2436_s20 }
 0x932   : > { %p2438_p7 = pnand %p2437_p4, %p2603_p5 }
 0x933   : > { %p2443_p11 = por %p2442_p10, %p2441_p9 }
 0x934   : > { %p2439_p8 = pneg %p2438_p7 }
 0x936   : > { %p2444_p12 = pnand %p2443_p11, %p2439_p8 }
 0x938   : > { %2447 = shalt.err (!%p2444_p12)
}
 0x939   : > { %2320 = dma.vmem_to_hbm [thread:$0]  (%p2603_p5), %s2909_s25, 128, %s2907_s2, %s1927_s17  }
 0x93a PF: > { %p2326_p13 = scmp.ge.s32.totalorder %s2482_s16, 2  ;;  %s1952_s0 = sand.u32 1, %s2470_s29  }
 0x93b   : > { %s1953_s3 = scalar_lea.sflag [#allocation4], %s1952_s0 }
 0x93c   : > { %p2323_p0 = pnand %p2326_p13, %p2607_p6 }
 0x93e   : > { %p2324_p1 = pneg %p2323_p0 }
 0x940   : > { %2465 = dma.done.wait (%p2324_p1), %s1953_s3, 128  }
 0x941   : > { %2467 = vsyncadd (%p2324_p1), %s1953_s3, 4294967168  ;;  %p24_p2 = scmp.ge.s32.totalorder %s2590_s19, 4   ;;  %s2974_s29 = smov %s2474_s30 }
 0x942   : > { %s2975_s30 = smov %s2478_s15  ;;  %s2976_s15 = smov %s2601_s22 }
 0x943   : > { %s2977_s16 = smov %s2590_s19  ;;  %26 = sbr.rel (!%p24_p2) target bundleno = 8 (0x8), region = 111 }
 0x948   :  { %1958 = vsyncpa [#allocation4], 1 }
 0x949   :  { %1960 = vsyncpa [#allocation4 + $0x1], 1 }

</bundles_post_ra>
